<compile_context>
chip_gen: v7x
topology: tpu7x:2x2x1
jax: 0.10.0
libtpu: 0.0.40
codegen_flags: <defaults>
</compile_context>

<pallas_src>
import functools
import math

import jax
import jax.numpy as jnp
from jax.experimental import pallas as pl
from jax.experimental.pallas import tpu as pltpu


# ---------------------------------------------------------------------------
# Pass 1: batch-global BatchNorm statistics, folded to (a, b) with hn = h0*a+b
# Reduction over batch tiles ("arbitrary" grid axis, accumulator scratch).
# ---------------------------------------------------------------------------
def _bn_stats_kernel(lab_ref, w1_ref, gamma_ref, beta_ref, ab_ref, counts_ref,
                     *, inv_n):
    tb = lab_ref.shape[0]
    y_dim = w1_ref.shape[0]
    i = pl.program_id(0)

    @pl.when(i == 0)
    def _():
        counts_ref[...] = jnp.zeros_like(counts_ref)

    labels = lab_ref[...]                                            # (TB, 1) i32
    classes = jax.lax.broadcasted_iota(jnp.int32, (tb, y_dim), 1)
    onehot = (labels == classes).astype(jnp.float32)                 # (TB, y_dim)
    counts_ref[...] += jnp.sum(onehot, axis=0, keepdims=True)        # (1, y_dim)

    @pl.when(i == pl.num_programs(0) - 1)
    def _():
        # h0 rows are rows of w1, so batch stats follow from class frequencies.
        w1 = w1_ref[...]
        p = counts_ref[...] * inv_n                                  # (1, y_dim)
        mean = jnp.dot(p, w1, preferred_element_type=jnp.float32)    # (1, zy)
        meansq = jnp.dot(p, w1 * w1, preferred_element_type=jnp.float32)
        var = meansq - mean * mean                                   # biased var
        a = gamma_ref[...] * jax.lax.rsqrt(var + 1e-5)
        b = beta_ref[...] - mean * a
        ab_ref[...] = jnp.concatenate([a, b], axis=0)                # (2, zy)


# ---------------------------------------------------------------------------
# Pass 2: per-tile forward.  Lane-dense (TB, OUT_PAD) output slab where
# cols [0, zy) = zy_loc and cols [zy, 2*zy) = zy_scale; rest is padding.
# ---------------------------------------------------------------------------
def _pzy_main_kernel(lab_ref, w1_ref, ab_ref, w_ref, b_ref, out_ref):
    tb = lab_ref.shape[0]
    y_dim, zy_dim = w1_ref.shape

    labels = lab_ref[...]                                            # (TB, 1) i32
    classes = jax.lax.broadcasted_iota(jnp.int32, (tb, y_dim), 1)
    onehot = (labels == classes).astype(jnp.float32)                 # (TB, y_dim)

    # fc1 (no bias): row-"gather" of w1 realized as one-hot @ w1 on the MXU.
    h0 = jnp.dot(onehot, w1_ref[...], preferred_element_type=jnp.float32)

    # Folded BatchNorm (training mode, batch-global a/b) + ReLU.
    a = ab_ref[0:1, :]
    b = ab_ref[1:2, :]
    h = jnp.maximum(h0 * a + b, 0.0)                                 # (TB, zy)

    # Fused fc21|fc22, zero-padded to the lane-dense slab width.
    u = jnp.dot(h, w_ref[...], preferred_element_type=jnp.float32) + b_ref[...]

    # cols [0, zy)    -> loc (identity)
    # cols [zy, ...)  -> softplus(.) + 1e-7   (PyTorch threshold = 20)
    sp = jnp.where(u > 20.0, u, jnp.log1p(jnp.exp(jnp.minimum(u, 20.0)))) + 1e-7
    col = jax.lax.broadcasted_iota(jnp.int32, u.shape, 1)
    out_ref[...] = jnp.where(col < zy_dim, u, sp)


def _round_up(x, m):
    return ((x + m - 1) // m) * m


@functools.partial(jax.jit, static_argnames=("tb",))
def pzy_forward(y, w1, gamma, beta, w21, b21, w22, b22, *, tb=8):
    """zy_loc, zy_scale = pzy(y).  y: int class labels of shape (B,)."""
    B = y.shape[0]
    y_dim, zy_dim = w1.shape
    assert tb % 8 == 0 and B % tb == 0, "batch must tile by a multiple of 8"
    num_tiles = B // tb
    out_pad = _round_up(2 * zy_dim, 128)          # lane-dense output width

    labels = y.astype(jnp.int32).reshape(B, 1)

    # Fuse fc21 / fc22 and zero-pad to the lane-dense width (layout plumbing).
    w_cat = jnp.concatenate([w21, w22], axis=1)                       # (zy, 2zy)
    w_pad = jnp.zeros((zy_dim, out_pad), jnp.float32).at[:, :2 * zy_dim].set(w_cat)
    b_cat = jnp.concatenate([b21, b22], axis=1)                       # (1, 2zy)
    b_pad = jnp.zeros((1, out_pad), jnp.float32).at[:, :2 * zy_dim].set(b_cat)

    vmem_limit = 32 * 1024 * 1024                 # fits v5e/v6e/v7x budgets

    # ---- Pass 1: batch-global folded BatchNorm vectors (a, b) -> (2, zy). ----
    ab = pl.pallas_call(
        functools.partial(_bn_stats_kernel, inv_n=1.0 / B),
        out_shape=jax.ShapeDtypeStruct((2, zy_dim), jnp.float32),
        grid_spec=pltpu.PrefetchScalarGridSpec(
            num_scalar_prefetch=0,
            grid=(num_tiles,),
            in_specs=[
                pl.BlockSpec((tb, 1), lambda i: (i, 0)),              # labels
                pl.BlockSpec((y_dim, zy_dim), lambda i: (0, 0)),      # w1
                pl.BlockSpec((1, zy_dim), lambda i: (0, 0)),          # gamma
                pl.BlockSpec((1, zy_dim), lambda i: (0, 0)),          # beta
            ],
            out_specs=pl.BlockSpec((2, zy_dim), lambda i: (0, 0)),
            scratch_shapes=[pltpu.VMEM((1, y_dim), jnp.float32)],     # class counts
        ),
        compiler_params=pltpu.CompilerParams(
            dimension_semantics=("arbitrary",),
            vmem_limit_bytes=vmem_limit,
        ),
    )(labels, w1, gamma, beta)

    # ---- Pass 2: tiled forward with lane-dense (B, out_pad) output. ----------
    flops = 2 * B * (y_dim * zy_dim + zy_dim * out_pad)
    bytes_accessed = 4 * (B + y_dim * zy_dim + 2 * zy_dim
                          + zy_dim * out_pad + out_pad + B * out_pad)
    out = pl.pallas_call(
        _pzy_main_kernel,
        out_shape=jax.ShapeDtypeStruct((B, out_pad), jnp.float32),
        grid_spec=pltpu.PrefetchScalarGridSpec(
            num_scalar_prefetch=0,
            grid=(num_tiles,),
            in_specs=[
                pl.BlockSpec((tb, 1), lambda i: (i, 0)),              # labels
                pl.BlockSpec((y_dim, zy_dim), lambda i: (0, 0)),      # w1
                pl.BlockSpec((2, zy_dim), lambda i: (0, 0)),          # folded BN
                pl.BlockSpec((zy_dim, out_pad), lambda i: (0, 0)),    # [w21|w22] pad
                pl.BlockSpec((1, out_pad), lambda i: (0, 0)),         # [b21|b22] pad
            ],
            out_specs=pl.BlockSpec((tb, out_pad), lambda i: (i, 0)),
        ),
        compiler_params=pltpu.CompilerParams(
            dimension_semantics=("parallel",),                        # v7x: 2 TCs
            vmem_limit_bytes=vmem_limit,
        ),
        cost_estimate=pl.CostEstimate(
            flops=flops,
            transcendentals=B * out_pad,
            bytes_accessed=bytes_accessed,
        ),
    )(labels, w1, ab, w_pad, b_pad)

    zy_loc = out[:, :zy_dim]
    zy_scale = out[:, zy_dim:2 * zy_dim]
    return zy_loc, zy_scale


# ---------------------------------------------------------------------------
# Deterministic parameter init (xavier-uniform, weights stored as (in, out)).
# ---------------------------------------------------------------------------
def xavier_uniform(key, fan_in, fan_out):
    bound = math.sqrt(6.0 / (fan_in + fan_out))
    return jax.random.uniform(key, (fan_in, fan_out), jnp.float32, -bound, bound)


if __name__ == "__main__":
    B = 32         # batch (multiple of the 8-row tile)
    y_dim = 6      # number of classes
    zy_dim = 32    # latent dim
    tb = 8         # batch tile -> 4 grid steps (exercises reduction + tiling)

    key = jax.random.PRNGKey(0)
    k_y, k_w1, k_w21, k_w22 = jax.random.split(key, 4)

    y = jax.random.randint(k_y, (B,), 0, y_dim, dtype=jnp.int32)

    w1 = xavier_uniform(k_w1, y_dim, zy_dim)              # fc1 Linear, no bias
    gamma = jnp.ones((1, zy_dim), jnp.float32)            # BatchNorm1d weight
    beta = jnp.zeros((1, zy_dim), jnp.float32)            # BatchNorm1d bias
    w21 = xavier_uniform(k_w21, zy_dim, zy_dim)           # fc21 Linear
    b21 = jnp.zeros((1, zy_dim), jnp.float32)             # fc21 bias (zeroed)
    w22 = xavier_uniform(k_w22, zy_dim, zy_dim)           # fc22 Linear
    b22 = jnp.zeros((1, zy_dim), jnp.float32)             # fc22 bias (zeroed)

    zy_loc, zy_scale = pzy_forward(y, w1, gamma, beta, w21, b21, w22, b22, tb=tb)
    jax.block_until_ready((zy_loc, zy_scale))

    # Reference check (PyTorch-equivalent math in plain JAX).
    y_onehot = jax.nn.one_hot(y, y_dim, dtype=jnp.float32)
    h0 = y_onehot @ w1
    mean = h0.mean(0, keepdims=True)
    var = ((h0 - mean) ** 2).mean(0, keepdims=True)
    h = jnp.maximum((h0 - mean) / jnp.sqrt(var + 1e-5) * gamma + beta, 0.0)
    ref_loc = h @ w21 + b21
    u = h @ w22 + b22
    ref_scale = jnp.where(u > 20.0, u,
                          jnp.log1p(jnp.exp(jnp.minimum(u, 20.0)))) + 1e-7

    assert jnp.allclose(zy_loc, ref_loc, atol=1e-4, rtol=1e-4), "zy_loc mismatch"
    assert jnp.allclose(zy_scale, ref_scale, atol=1e-4, rtol=1e-4), "zy_scale mismatch"

    print("KERNEL_OK")
</pallas_src>

<mosaic_0001>
module attributes {stable_mosaic.version = 11 : i64} {
  func.func @_pzy_main_kernel(%arg0: i32, %arg1: memref<8x1xi32, #tpu.memory_space<vmem>>, %arg2: memref<6x32xf32, #tpu.memory_space<vmem>>, %arg3: memref<2x32xf32, #tpu.memory_space<vmem>>, %arg4: memref<32x128xf32, #tpu.memory_space<vmem>>, %arg5: memref<1x128xf32, #tpu.memory_space<vmem>>, %arg6: memref<8x128xf32, #tpu.memory_space<vmem>>) attributes {dimension_semantics = [#tpu.dimension_semantics<parallel>], iteration_bounds = array<i64: 4>, scalar_prefetch = 0 : i64, scratch_operands = 0 : i64, tpu.core_type = #tpu.core_type<tc>, window_params = [{transform_indices = @transform_0, window_bounds = array<i64: 8, 1>}, {pipeline_mode = #tpu.pipeline_mode<synchronous>, transform_indices = @transform_1, window_bounds = array<i64: 6, 32>}, {pipeline_mode = #tpu.pipeline_mode<synchronous>, transform_indices = @transform_2, window_bounds = array<i64: 2, 32>}, {pipeline_mode = #tpu.pipeline_mode<synchronous>, transform_indices = @transform_3, window_bounds = array<i64: 32, 128>}, {pipeline_mode = #tpu.pipeline_mode<synchronous>, transform_indices = @transform_4, window_bounds = array<i64: 1, 128>}, {transform_indices = @transform_5, window_bounds = array<i64: 8, 128>}]} {
    %c0 = arith.constant 0 : index
    %c0_0 = arith.constant 0 : index
    %0 = vector.load %arg1[%c0, %c0_0] : memref<8x1xi32, #tpu.memory_space<vmem>>, vector<8x1xi32>
    %1 = tpu.iota {dimensions = array<i32: 1>} : vector<8x6xi32>
    %2 = vector.broadcast %0 : vector<8x1xi32> to vector<8x6xi32>
    %3 = arith.cmpi eq, %2, %1 : vector<8x6xi32>
    %4 = arith.extui %3 : vector<8x6xi1> to vector<8x6xi32>
    %5 = arith.sitofp %4 : vector<8x6xi32> to vector<8x6xf32>
    %c0_1 = arith.constant 0 : index
    %c0_2 = arith.constant 0 : index
    %6 = vector.load %arg2[%c0_1, %c0_2] : memref<6x32xf32, #tpu.memory_space<vmem>>, vector<6x32xf32>
    %cst = arith.constant dense<0.000000e+00> : vector<8x32xf32>
    %7 = tpu.matmul %5, %6, %cst {dimension_numbers = #tpu.dot_dimension_numbers<[1], [0], [0], [1], [0, 0, 1, 1], [], []>} : vector<8x6xf32>, vector<6x32xf32>, vector<8x32xf32> -> vector<8x32xf32>
    %c0_3 = arith.constant 0 : index
    %c0_4 = arith.constant 0 : index
    %8 = vector.load %arg3[%c0_3, %c0_4] : memref<2x32xf32, #tpu.memory_space<vmem>>, vector<1x32xf32>
    %c1 = arith.constant 1 : index
    %c0_5 = arith.constant 0 : index
    %9 = vector.load %arg3[%c1, %c0_5] : memref<2x32xf32, #tpu.memory_space<vmem>>, vector<1x32xf32>
    %10 = vector.broadcast %8 : vector<1x32xf32> to vector<8x32xf32>
    %11 = arith.mulf %7, %10 : vector<8x32xf32>
    %12 = vector.broadcast %9 : vector<1x32xf32> to vector<8x32xf32>
    %13 = arith.addf %11, %12 : vector<8x32xf32>
    %cst_6 = arith.constant 0.000000e+00 : f32
    %14 = vector.broadcast %cst_6 : f32 to vector<8x32xf32>
    %15 = arith.maximumf %13, %14 : vector<8x32xf32>
    %c0_7 = arith.constant 0 : index
    %c0_8 = arith.constant 0 : index
    %16 = vector.load %arg4[%c0_7, %c0_8] : memref<32x128xf32, #tpu.memory_space<vmem>>, vector<32x128xf32>
    %cst_9 = arith.constant dense<0.000000e+00> : vector<8x128xf32>
    %17 = tpu.matmul %15, %16, %cst_9 {dimension_numbers = #tpu.dot_dimension_numbers<[1], [0], [0], [1], [0, 0, 1, 1], [], []>} : vector<8x32xf32>, vector<32x128xf32>, vector<8x128xf32> -> vector<8x128xf32>
    %c0_10 = arith.constant 0 : index
    %c0_11 = arith.constant 0 : index
    %18 = vector.load %arg5[%c0_10, %c0_11] : memref<1x128xf32, #tpu.memory_space<vmem>>, vector<1x128xf32>
    %19 = vector.broadcast %18 : vector<1x128xf32> to vector<8x128xf32>
    %20 = arith.addf %17, %19 : vector<8x128xf32>
    %cst_12 = arith.constant 2.000000e+01 : f32
    %21 = vector.broadcast %cst_12 : f32 to vector<8x128xf32>
    %22 = arith.cmpf ogt, %20, %21 : vector<8x128xf32>
    %cst_13 = arith.constant 2.000000e+01 : f32
    %23 = vector.broadcast %cst_13 : f32 to vector<8x128xf32>
    %24 = arith.minimumf %20, %23 : vector<8x128xf32>
    %25 = math.exp %24 : vector<8x128xf32>
    %26 = math.log1p %25 : vector<8x128xf32>
    %27 = arith.select %22, %20, %26 : vector<8x128xi1>, vector<8x128xf32>
    %cst_14 = arith.constant 1.000000e-07 : f32
    %28 = vector.broadcast %cst_14 : f32 to vector<8x128xf32>
    %29 = arith.addf %27, %28 : vector<8x128xf32>
    %30 = tpu.iota {dimensions = array<i32: 1>} : vector<8x128xi32>
    %c32_i32 = arith.constant 32 : i32
    %31 = vector.broadcast %c32_i32 : i32 to vector<8x128xi32>
    %32 = arith.cmpi slt, %30, %31 : vector<8x128xi32>
    %33 = arith.select %32, %20, %29 : vector<8x128xi1>, vector<8x128xf32>
    %c0_15 = arith.constant 0 : index
    %c0_16 = arith.constant 0 : index
    %34 = vector.load %arg6[%c0_15, %c0_16] : memref<8x128xf32, #tpu.memory_space<vmem>>, vector<8x128xf32>
    tpu.vector_store %arg6[%c0_15, %c0_16], %33 {strides = array<i32>} : memref<8x128xf32, #tpu.memory_space<vmem>>, vector<8x128xf32>,
    return
  }
  func.func @transform_0(%arg0: i32) -> (i32, i32) {
    %c0_i32 = arith.constant 0 : i32
    %c0_i32_0 = arith.constant 0 : i32
    return %arg0, %c0_i32 : i32, i32
  }
  func.func @transform_1(%arg0: i32) -> (i32, i32) {
    %c0_i32 = arith.constant 0 : i32
    %c0_i32_0 = arith.constant 0 : i32
    %c0_i32_1 = arith.constant 0 : i32
    return %c0_i32, %c0_i32_0 : i32, i32
  }
  func.func @transform_2(%arg0: i32) -> (i32, i32) {
    %c0_i32 = arith.constant 0 : i32
    %c0_i32_0 = arith.constant 0 : i32
    %c0_i32_1 = arith.constant 0 : i32
    return %c0_i32, %c0_i32_0 : i32, i32
  }
  func.func @transform_3(%arg0: i32) -> (i32, i32) {
    %c0_i32 = arith.constant 0 : i32
    %c0_i32_0 = arith.constant 0 : i32
    %c0_i32_1 = arith.constant 0 : i32
    return %c0_i32, %c0_i32_0 : i32, i32
  }
  func.func @transform_4(%arg0: i32) -> (i32, i32) {
    %c0_i32 = arith.constant 0 : i32
    %c0_i32_0 = arith.constant 0 : i32
    %c0_i32_1 = arith.constant 0 : i32
    return %c0_i32, %c0_i32_0 : i32, i32
  }
  func.func @transform_5(%arg0: i32) -> (i32, i32) {
    %c0_i32 = arith.constant 0 : i32
    %c0_i32_0 = arith.constant 0 : i32
    return %arg0, %c0_i32 : i32, i32
  }
}

module attributes {stable_mosaic.version = 11 : i64} {
  func.func @_bn_stats_kernel(%arg0: i32, %arg1: memref<8x1xi32, #tpu.memory_space<vmem>>, %arg2: memref<6x32xf32, #tpu.memory_space<vmem>>, %arg3: memref<1x32xf32, #tpu.memory_space<vmem>>, %arg4: memref<1x32xf32, #tpu.memory_space<vmem>>, %arg5: memref<2x32xf32, #tpu.memory_space<vmem>>, %arg6: memref<1x6xf32, #tpu.memory_space<vmem>>) attributes {dimension_semantics = [#tpu.dimension_semantics<arbitrary>], iteration_bounds = array<i64: 4>, scalar_prefetch = 0 : i64, scratch_operands = 1 : i64, tpu.core_type = #tpu.core_type<tc>, window_params = [{transform_indices = @transform_0, window_bounds = array<i64: 8, 1>}, {pipeline_mode = #tpu.pipeline_mode<synchronous>, transform_indices = @transform_1, window_bounds = array<i64: 6, 32>}, {pipeline_mode = #tpu.pipeline_mode<synchronous>, transform_indices = @transform_2, window_bounds = array<i64: 1, 32>}, {pipeline_mode = #tpu.pipeline_mode<synchronous>, transform_indices = @transform_3, window_bounds = array<i64: 1, 32>}, {pipeline_mode = #tpu.pipeline_mode<synchronous>, transform_indices = @transform_4, window_bounds = array<i64: 2, 32>}]} {
    %c0_i32 = arith.constant 0 : i32
    %0 = arith.cmpi eq, %arg0, %c0_i32 : i32
    %1 = arith.extui %0 : i1 to i32
    %c0_i32_0 = arith.constant 0 : i32
    %2 = arith.cmpi ne, %1, %c0_i32_0 : i32
    scf.if %2 {
      %cst_7 = arith.constant 0.000000e+00 : f32
      %17 = vector.broadcast %cst_7 : f32 to vector<1x6xf32>
      %c0_8 = arith.constant 0 : index
      %c0_9 = arith.constant 0 : index
      %18 = vector.load %arg6[%c0_8, %c0_9] : memref<1x6xf32, #tpu.memory_space<vmem>>, vector<1x6xf32>
      tpu.vector_store %arg6[%c0_8, %c0_9], %17 {strides = array<i32>} : memref<1x6xf32, #tpu.memory_space<vmem>>, vector<1x6xf32>,
    } else {
    }
    %c0 = arith.constant 0 : index
    %c0_1 = arith.constant 0 : index
    %3 = vector.load %arg1[%c0, %c0_1] : memref<8x1xi32, #tpu.memory_space<vmem>>, vector<8x1xi32>
    %4 = tpu.iota {dimensions = array<i32: 1>} : vector<8x6xi32>
    %5 = vector.broadcast %3 : vector<8x1xi32> to vector<8x6xi32>
    %6 = arith.cmpi eq, %5, %4 : vector<8x6xi32>
    %7 = arith.extui %6 : vector<8x6xi1> to vector<8x6xi32>
    %8 = arith.sitofp %7 : vector<8x6xi32> to vector<8x6xf32>
    %c0_2 = arith.constant 0 : index
    %c0_3 = arith.constant 0 : index
    %9 = vector.load %arg6[%c0_2, %c0_3] : memref<1x6xf32, #tpu.memory_space<vmem>>, vector<1x6xf32>
    %cst = arith.constant dense<0.000000e+00> : vector<6xf32>
    %10 = vector.multi_reduction <add>, %8, %cst [0] : vector<8x6xf32> to vector<6xf32>
    %11 = vector.shape_cast %10 : vector<6xf32> to vector<1x6xf32>
    %12 = arith.addf %9, %11 : vector<1x6xf32>
    %c0_4 = arith.constant 0 : index
    %c0_5 = arith.constant 0 : index
    %13 = vector.load %arg6[%c0_4, %c0_5] : memref<1x6xf32, #tpu.memory_space<vmem>>, vector<1x6xf32>
    tpu.vector_store %arg6[%c0_4, %c0_5], %12 {strides = array<i32>} : memref<1x6xf32, #tpu.memory_space<vmem>>, vector<1x6xf32>,
    %c3_i32 = arith.constant 3 : i32
    %14 = arith.cmpi eq, %arg0, %c3_i32 : i32
    %15 = arith.extui %14 : i1 to i32
    %c0_i32_6 = arith.constant 0 : i32
    %16 = arith.cmpi ne, %15, %c0_i32_6 : i32
    scf.if %16 {
      %c0_7 = arith.constant 0 : index
      %c0_8 = arith.constant 0 : index
      %17 = vector.load %arg2[%c0_7, %c0_8] : memref<6x32xf32, #tpu.memory_space<vmem>>, vector<6x32xf32>
      %c0_9 = arith.constant 0 : index
      %c0_10 = arith.constant 0 : index
      %18 = vector.load %arg6[%c0_9, %c0_10] : memref<1x6xf32, #tpu.memory_space<vmem>>, vector<1x6xf32>
      %cst_11 = arith.constant 3.125000e-02 : f32
      %19 = vector.broadcast %cst_11 : f32 to vector<1x6xf32>
      %20 = arith.mulf %18, %19 : vector<1x6xf32>
      %cst_12 = arith.constant dense<0.000000e+00> : vector<1x32xf32>
      %21 = tpu.matmul %20, %17, %cst_12 {dimension_numbers = #tpu.dot_dimension_numbers<[1], [0], [0], [1], [0, 0, 1, 1], [], []>} : vector<1x6xf32>, vector<6x32xf32>, vector<1x32xf32> -> vector<1x32xf32>
      %22 = arith.mulf %17, %17 : vector<6x32xf32>
      %cst_13 = arith.constant dense<0.000000e+00> : vector<1x32xf32>
      %23 = tpu.matmul %20, %22, %cst_13 {dimension_numbers = #tpu.dot_dimension_numbers<[1], [0], [0], [1], [0, 0, 1, 1], [], []>} : vector<1x6xf32>, vector<6x32xf32>, vector<1x32xf32> -> vector<1x32xf32>
      %24 = arith.mulf %21, %21 : vector<1x32xf32>
      %25 = arith.subf %23, %24 : vector<1x32xf32>
      %c0_14 = arith.constant 0 : index
      %c0_15 = arith.constant 0 : index
      %26 = vector.load %arg3[%c0_14, %c0_15] : memref<1x32xf32, #tpu.memory_space<vmem>>, vector<1x32xf32>
      %cst_16 = arith.constant 9.99999974E-6 : f32
      %27 = vector.broadcast %cst_16 : f32 to vector<1x32xf32>
      %28 = arith.addf %25, %27 : vector<1x32xf32>
      %29 = math.rsqrt %28 : vector<1x32xf32>
      %30 = arith.mulf %26, %29 : vector<1x32xf32>
      %c0_17 = arith.constant 0 : index
      %c0_18 = arith.constant 0 : index
      %31 = vector.load %arg4[%c0_17, %c0_18] : memref<1x32xf32, #tpu.memory_space<vmem>>, vector<1x32xf32>
      %32 = arith.mulf %21, %30 : vector<1x32xf32>
      %33 = arith.subf %31, %32 : vector<1x32xf32>
      %34 = tpu.concatenate %30, %33 in 0 : vector<1x32xf32>, vector<1x32xf32> -> vector<2x32xf32>
      %c0_19 = arith.constant 0 : index
      %c0_20 = arith.constant 0 : index
      %35 = vector.load %arg5[%c0_19, %c0_20] : memref<2x32xf32, #tpu.memory_space<vmem>>, vector<2x32xf32>
      tpu.vector_store %arg5[%c0_19, %c0_20], %34 {strides = array<i32>} : memref<2x32xf32, #tpu.memory_space<vmem>>, vector<2x32xf32>,
    } else {
    }
    return
  }
  func.func @transform_0(%arg0: i32) -> (i32, i32) {
    %c0_i32 = arith.constant 0 : i32
    %c0_i32_0 = arith.constant 0 : i32
    return %arg0, %c0_i32 : i32, i32
  }
  func.func @transform_1(%arg0: i32) -> (i32, i32) {
    %c0_i32 = arith.constant 0 : i32
    %c0_i32_0 = arith.constant 0 : i32
    %c0_i32_1 = arith.constant 0 : i32
    return %c0_i32, %c0_i32_0 : i32, i32
  }
  func.func @transform_2(%arg0: i32) -> (i32, i32) {
    %c0_i32 = arith.constant 0 : i32
    %c0_i32_0 = arith.constant 0 : i32
    %c0_i32_1 = arith.constant 0 : i32
    return %c0_i32, %c0_i32_0 : i32, i32
  }
  func.func @transform_3(%arg0: i32) -> (i32, i32) {
    %c0_i32 = arith.constant 0 : i32
    %c0_i32_0 = arith.constant 0 : i32
    %c0_i32_1 = arith.constant 0 : i32
    return %c0_i32, %c0_i32_0 : i32, i32
  }
  func.func @transform_4(%arg0: i32) -> (i32, i32) {
    %c0_i32 = arith.constant 0 : i32
    %c0_i32_0 = arith.constant 0 : i32
    %c0_i32_1 = arith.constant 0 : i32
    return %c0_i32, %c0_i32_0 : i32, i32
  }
}

</mosaic_0001>

<bundles_post_ra>
// kernel: pzy_forward.2
= control target key start
LH: loop header
LB: loop body
LE: loop exit
PB: predicated region body
PF: predicated region fallthrough
CT: control target
= control target key end

     0   :  { %s494_s15 = smov 0   ;;  %s529_s0 = inlined_call_operand.vmem [shape: s32[32,1], index: 0, kind: input, shape index: {}]   ;;  %s530_s1 = inlined_call_operand.vmem [shape: f32[6,32], index: 1, kind: input, shape index: {}]   ;;  %s531_s2 = inlined_call_operand.vmem [shape: f32[1,32], index: 2, kind: input, shape index: {}]   ;;  %s532_s3 = inlined_call_operand.vmem [shape: f32[1,32], index: 3, kind: input, shape index: {}]   ;;  %s533_s4 = inlined_call_operand.vmem [shape: f32[2,32], index: 4, kind: output, shape index: {}]  }
   0x1 LB: > { %s500_s16 = sadd.s32 4294967295, %s462_s15   ;;  %p415_p0 = scmp.ge.s32.totalorder %s462_s15, 1  ;;  %s462_s15 = sphi %s494_s15, %s14_s15  }
   0x2   : > { %p156_p1 = scmp.lt.s32.totalorder %s462_s15, 5 }
   0x4   : > { %p157_p2 = pnand %p415_p0, %p156_p1 }
   0x5   : > { %p176_p3 = scmp.lt.s32.totalorder (!%p157_p2), %s500_s16, 3  ;;  %p417_p4 = scmp.ne.s32.totalorder (!%p157_p2), %s500_s16, 0 }
   0x6   : > { %160 = sbr.rel (%p157_p2) target bundleno = 417 (0x1a1), region = 36 }
   0xd   : > { %s177_s17 = scalar_select %p176_p3, %s500_s16, 3 }
   0xe   : > { %183 = sbr.rel (%p417_p4) target bundleno = 21 (0x15), region = 40  ;;  %vm184_vm0 = vcmask (!%p417_p4), 40960   ;;  %v464_v0 = vmov (!%p417_p4), 0.0  }
   0xf   : > { %s416_s18 = sshll.u32 %s177_s17, 3  ;;  %185 = vst.msk [vmem:[#allocation2] sm:$0x1] (!%p417_p4), %vm184_vm0, %v464_v0 }
  0x10   : > { %s179_s21 = scalar_lea.vmem %s529_s0, %s416_s18 }
  0x15 PF: > { %v186_v1 = vld [vmem:[%s179_s21] sm:$0xff]  ;;  %v465_v2 = vmov 0   ;;  %v187_v3 = vlaneseq  ;;  %vm196_vm1 = vcmask 48128   ;;  %v466_v6 = vmov 0.0   ;;  %p419_p5 = scmp.ne.s32.totalorder %s500_s16, 3 }
  0x16   : > { %453 = vset.pattern.permute.xlu0 %v465_v2  ;;  %v195_v14 = vld [vmem:[#allocation2] sm:$0x1]  ;;  %vm205_vm3 = vcmask 40960   ;;  %vm217_vm4 = vcmask (!%p419_p5), 1045504   ;;  %v467_v18 = vmov (!%p419_p5), 0.0   ;;  %vm468_vm5 = vmmov (!%p419_p5), 0  }
  0x17   : > { %190 = vperm.xlu0 %453, %v186_v1   ;;  %v188_v4 = vand.u32 127, %v187_v3  ;;  %v211_v17 = vld [vmem:[%s530_s1] sm:$0x3f] (!%p419_p5)  ;;  %430 = vmatprep.subr.mxu0 (!%p419_p5), %v467_v18  ;;  %v376_v30 = vshrl.u32 (!%p419_p5), %v187_v3, 7  ;;  %vm380_vm6 = vcmask (!%p419_p5), 1040384   ;;  %vm382_vm7 = vcmask (!%p419_p5), 254976  }
  0x18   : > { %v291_v19 = vmul.f32 (!%p419_p5), %v211_v17, %v211_v17  ;;  %432 = vmatprep.mubr.msk.f32.mxu0 (!%p419_p5), %vm468_vm5, %v467_v18  ;;  %431 = vmatpush3.msk.msra.mxu0 (!%p419_p5), %vm217_vm4, %v211_v17  ;;  %v367_v29 = vld [vmem:[%s531_s2] sm:$0x1] (!%p419_p5) }
  0x19   : > { %435 = vmatprep.subr.mxu1 (!%p419_p5), %v467_v18  ;;  %437 = vmatprep.mubr.msk.f32.mxu1 (!%p419_p5), %vm468_vm5, %v467_v18  ;;  %v371_v33 = vld [vmem:[%s532_s3] sm:$0x1] (!%p419_p5)  ;;  %v377_v35 = vsub.s32 (!%p419_p5), 0, %v376_v30 }
  0x1a   : > { %436 = vmatpush3.msk.msra.mxu1 (!%p419_p5), %vm217_vm4, %v291_v19 }
  0x96   : > { %v191_v5 = vpop.permute.xlu0 %190 }
  0x97   : > { %vm192_vm2 = vcmp.eq.s32.totalorder %v191_v5, %v188_v4 }
  0x98   : > { %v418_v7 = vsel %vm192_vm2, 1.0, %v466_v6 }
  0x99   : > { %v197_v8 = vsel %vm196_vm1, %v418_v7, 0.0 }
  0x9a   : > { %v198_v9 = vrot.slane %v197_v8, 4 }
  0x9c   : > { %v199_v10 = vadd.f32 %v198_v9, %v197_v8 }
  0x9e   : > { %v200_v11 = vrot.slane %v199_v10, 2 }
  0xa0   : > { %v201_v12 = vadd.f32 %v200_v11, %v199_v10 }
  0xa2   : > { %v202_v13 = vrot.slane %v201_v12, 1  ;;  %210 = sbr.rel (%p419_p5) target bundleno = 417 (0x1a1), region = 44 }
  0xa4   : > { %v203_v15 = vadd.f32 %v202_v13, %v201_v12 }
  0xa6   : > { %v204_v16 = vadd.f32 %v203_v15, %v195_v14 }
  0xa8   : > { %206 = vst.msk [vmem:[#allocation2] sm:$0x1] %vm205_vm3, %v204_v16 }
  0xaf   : > { %v212_v20 = vld [vmem:[#allocation2] sm:$0x1] }
  0xb0   : > { %v213_v21 = vmul.f32 0.03125, %v212_v20 }
  0xb2   : > { %433 = vmatmul.mubr.msk.f32.vlgmr.msra.gmra.mrb[0].mxu0 %vm196_vm1, %v213_v21  ;;  %438 = vmatmul.mubr.msk.f32.vlgmr.msra.gmra.mrb[0].mxu1 %vm196_vm1, %v213_v21 }
 0x185   : > { %v287_v22 = vpop.f32.mrb[0].mxu0  ;;  %v361_v23 = vpop.f32.mrb[0].mxu1 }
 0x186   : > { %v365_v24 = vmul.f32 %v287_v22, %v287_v22  ;;  %v434_v25 = vpop.f32.mrb[1].mxu0  ;;  %v439_v26 = vpop.f32.mrb[1].mxu1 }
 0x188   : > { %v366_v27 = vsub.f32 %v361_v23, %v365_v24 }
 0x18a   : > { %v368_v28 = vadd.f32 1e-05, %v366_v27 }
 0x18c   : > { %454 = vrsqrt.f32 %v368_v28 }
 0x196   : > { %v455_v31 = vpop.eup %454 }
 0x197   : > { %v370_v32 = vmul.f32 %v455_v31, %v367_v29 }
 0x199   : > { %v372_v34 = vmul.f32 %v370_v32, %v287_v22 }
 0x19b   : > { %v373_v36 = vsub.f32 %v371_v33, %v372_v34 }
 0x19d   : > { %v378_v37 = vrot.slane %v373_v36, %v377_v35 }
 0x19f   : > { %v381_v38 = vsel %vm380_vm6, %v370_v32, %v378_v37 }
 0x1a0   : > { %383 = vst.msk [vmem:[%s533_s4] sm:$0x3] %vm382_vm7, %v381_v38 }
 0x1a1 PF: > { %s14_s15 = sadd.s32 1, %s462_s15  }
 0x1a2   : > { %p11_p6 = scmp.ge.s32.totalorder %s14_s15, 6  }
 0x1a4   :  { %13 = sbr.rel (!%p11_p6) target bundleno = 1 (0x1), region = 70 }

// kernel: pzy_forward.3
= control target key start
LH: loop header
LB: loop body
LE: loop exit
PB: predicated region body
PF: predicated region fallthrough
CT: control target
= control target key end

     0   :  { %s581_s18 = smov 0   ;;  %s629_s0 = inlined_call_operand.vmem [shape: s32[32,1], index: 0, kind: input, shape index: {}]   ;;  %s630_s1 = inlined_call_operand.vmem [shape: f32[6,32], index: 1, kind: input, shape index: {}]   ;;  %s631_s2 = inlined_call_operand.vmem [shape: f32[2,32], index: 2, kind: input, shape index: {}]   ;;  %s632_s3 = inlined_call_operand.vmem [shape: f32[32,128], index: 3, kind: input, shape index: {}]   ;;  %s633_s4 = inlined_call_operand.vmem [shape: f32[1,128], index: 4, kind: input, shape index: {}]   ;;  %s634_s5 = inlined_call_operand.vmem [shape: f32[32,128], index: 5, kind: output, shape index: {}]  }
   0x1 LB: > { %s477_s19 = sadd.s32 4294967295, %s545_s18   ;;  %p481_p0 = scmp.ge.s32.totalorder %s545_s18, 1  ;;  %s545_s18 = sphi %s581_s18, %s15_s18  }
   0x2   : > { %p186_p1 = scmp.lt.s32.totalorder %s545_s18, 5 }
   0x4   : > { %p187_p2 = pnand %p481_p0, %p186_p1 }
   0x5   : > { %p212_p3 = scmp.lt.s32.totalorder (!%p187_p2), %s477_s19, 3  ;;  %v547_v0 = vmov (!%p187_p2), 0   ;;  %v548_v1 = vmov (!%p187_p2), 0.0   ;;  %v229_v3 = vld [vmem:[%s630_s1] sm:$0x3f] (!%p187_p2)  ;;  %vm234_vm0 = vcmask (!%p187_p2), 1045504   ;;  %v221_v5 = vlaneseq (!%p187_p2) }
   0x6   : > { %190 = sbr.rel (%p187_p2) target bundleno = 615 (0x267), region = 40  ;;  %534 = vset.pattern.permute.xlu0 (!%p187_p2), %v547_v0  ;;  %500 = vmatprep.subr.mxu0 (!%p187_p2), %v548_v1  ;;  %vm549_vm1 = vmmov (!%p187_p2), 0   ;;  %v550_v4 = vmov (!%p187_p2), 0.0|0.0   ;;  %vm230_vm2 = vcmask (!%p187_p2), 48128   ;;  %v321_v9 = vld [vmem:[%s632_s3] sm:$0xff] (!%p187_p2)  ;;  %v322_v10 = vld [vmem:[%s632_s3 + $0x8] sm:$0xff] (!%p187_p2) }
   0x7   : > { %501 = vmatpush3.msk.msra.mxu0 (!%p187_p2), %vm234_vm0, %v229_v3  ;;  %502 = vmatprep.mubr.msk.f32.mxu0 (!%p187_p2), %vm549_vm1, %v548_v1  ;;  %v222_v6 = vand.u32 (!%p187_p2), 127, %v221_v5  ;;  %v517_v11 = vpack.c.bf16 (!%p187_p2), %v322_v10, %v321_v9  ;;  %v323_v12 = vld [vmem:[%s632_s3 + $0x10] sm:$0xff] (!%p187_p2)  ;;  %v324_v13 = vld [vmem:[%s632_s3 + $0x18] sm:$0xff] (!%p187_p2)  ;;  %v487_v15 = vld [vmem:[%s631_s2] ss:$0 sm:$0xff] (!%p187_p2)  ;;  %vm332_vm4 = vcmask (!%p187_p2), 261120  }
   0x8   : > { %513 = vmatprep.mubr.msk.f32.mxu1 (!%p187_p2), %vm549_vm1, %v548_v1  ;;  %516 = vmatprep.subr.bf16.mxu1 (!%p187_p2), %v550_v4  ;;  %v520_v14 = vpack.c.bf16 (!%p187_p2), %v324_v13, %v323_v12  ;;  %v488_v17 = vld [vmem:[%s631_s2 + $0x1] ss:$0 sm:$0xff] (!%p187_p2)  ;;  %v489_v22 = vld [vmem:[%s633_s4] ss:$0 sm:$0xff] (!%p187_p2) }
   0x9   : > { %518 = vmatpush3.bf16.msra.mxu1 (!%p187_p2), %v517_v11  ;;  %vm421_vm7 = vcmp.lt.s32.totalorder (!%p187_p2), %v222_v6, 32 }
   0xa   : > { %519 = vmatprep.subr.bf16.mxu1 (!%p187_p2), %v550_v4 }
   0xd   : > { %s636_s19 = smov (!%p212_p3, %s477_s19), 3  ;;  %521 = vmatpush3.bf16.msra.mxu1 %v520_v14 }
   0xe   : > { %s482_s20 = sshll.u32 %s636_s19, 3 }
   0xf   : > { %s215_s23 = scalar_lea.vmem %s629_s0, %s482_s20  ;;  %s219_s17 = scalar_lea.vmem %s634_s5, %s482_s20 }
  0x10   : > { %v220_v2 = vld [vmem:[%s215_s23] sm:$0xff] }
  0x11   : > { %224 = vperm.xlu0 %534, %v220_v2  }
  0x90   : > { %v225_v7 = vpop.permute.xlu0 %224 }
  0x91   : > { %vm226_vm3 = vcmp.eq.s32.totalorder %v225_v7, %v222_v6 }
  0x92   : > { %v484_v8 = vsel %vm226_vm3, 1.0, %v548_v1 }
  0x93   : > { %503 = vmatmul.mubr.msk.f32.vlgmr.msra.gmra.mrb[0].mxu0 %vm230_vm2, %v484_v8 }
 0x166   : > { %v304_v16 = vpop.f32.mrb[0].mxu0 }
 0x167   : > { %v314_v18 = vmul.f32 %v487_v15, %v304_v16  ;;  %v504_v19 = vpop.f32.mrb[1].mxu0 }
 0x169   : > { %v319_v20 = vadd.f32 %v488_v17, %v314_v18 }
 0x16b   : > { %v320_v21 = vmax.f32 %v319_v20, 0.0 }
 0x16d   : > { %514 = vmatmul.mubr.msk.f32.vlgmr.msra.gmra.mrb[0].mxu1 %vm332_vm4, %v320_v21 }
 0x240   : > { %v402_v23 = vpop.f32.mrb[0].mxu1 }
 0x241   : > { %v403_v24 = vadd.f32 %v489_v22, %v402_v23  ;;  %v515_v25 = vpop.f32.mrb[1].mxu1 }
 0x243   : > { %v407_v26 = vmin.f32 %v403_v24, 20.0  ;;  %vm406_vm6 = vcmp.gt.f32.partialorder %v403_v24, 20.0 }
 0x245   : > { %v408_v27 = vmul.f32 1.442695, %v407_v26 }
 0x247   : > { %535 = vpow2.f32 %v408_v27 }
 0x251   : > { %v536_v28 = vpop.eup %535 }
 0x252   : > { %v410_v29 = vadd.f32 1.0, %v536_v28  ;;  %v413_v30 = vmul.f32 -0.5, %v536_v28  ;;  %v416_v32 = vand.u32 2147483647, %v536_v28 }
 0x254   : > { %537 = vlog2.f32 %v410_v29  ;;  %v414_v31 = vadd.f32 1.0, %v413_v30  ;;  %vm417_vm5 = vcmp.lt.f32.partialorder %v416_v32, 0.0004427343 }
 0x256   : > { %v415_v35 = vmul.f32 %v536_v28, %v414_v31 }
 0x25e   : > { %v538_v33 = vpop.eup %537 }
 0x25f   : > { %v412_v34 = vmul.f32 0.6931472, %v538_v33 }
 0x261   : > { %v418_v36 = vsel %vm417_vm5, %v415_v35, %v412_v34 }
 0x262   : > { %v419_v37 = vsel %vm406_vm6, %v403_v24, %v418_v36 }
 0x263   : > { %v420_v38 = vadd.f32 1e-07, %v419_v37 }
 0x265   : > { %v422_v39 = vsel %vm421_vm7, %v403_v24, %v420_v38 }
 0x266   : > { %423 = vst [vmem:[%s219_s17] sm:$0xff] %v422_v39 }
 0x267 PF: > { %s15_s18 = sadd.s32 1, %s545_s18  }
 0x268   : > { %p12_p4 = scmp.ge.s32.totalorder %s15_s18, 6  }
 0x26a   :  { %14 = sbr.rel (!%p12_p4) target bundleno = 1 (0x1), region = 70 }

</bundles_post_ra>
